<compile_context>
chip_gen: v5e
topology: v5e:2x2
jax: 0.10.0
libtpu: 0.0.40
codegen_flags: <defaults>
</compile_context>

<pallas_src>
import jax
import jax.numpy as jnp
from jax.experimental import pallas as pl
from jax.experimental.pallas import tpu as pltpu

LANE = 128
SUBLANE = 8


def _round_up(n, m):
    return ((n + m - 1) // m) * m


def _sigmoid(x):
    # Stable sigmoid: no inf intermediates; exp + approx reciprocal both go to the EUP slot.
    z = jnp.exp(-jnp.abs(x))
    pos = pl.reciprocal(1.0 + z, approx=True)      # sigmoid(|x|)
    return jnp.where(x >= 0, pos, 1.0 - pos)


def autoencoder_kernel(x_ref,
                       w1_ref, b1_ref,
                       w2_ref, b2_ref,
                       w3_ref, b3_ref,
                       w4_ref, b4_ref,
                       o_ref):
    x = x_ref[...]                                  # (TILE_B, F) f32

    # ---- encoder ----
    h1 = jnp.maximum(
        jnp.dot(x, w1_ref[...], preferred_element_type=jnp.float32) + b1_ref[...], 0.0)
    h2 = jnp.maximum(
        jnp.dot(h1, w2_ref[...], preferred_element_type=jnp.float32) + b2_ref[...], 0.0)
    code = _sigmoid(h2)

    # ---- decoder ----
    h3 = jnp.maximum(
        jnp.dot(code, w3_ref[...], preferred_element_type=jnp.float32) + b3_ref[...], 0.0)
    h4 = jnp.dot(h3, w4_ref[...], preferred_element_type=jnp.float32) + b4_ref[...]
    o_ref[...] = _sigmoid(h4).astype(o_ref.dtype)


def init_params(key, input_size, encoding_dim):
    """Deterministic init mimicking torch.nn.Linear (uniform +/- 1/sqrt(fan_in)).
    Weights stored as (in_features, out_features), biases as (1, out_features), all f32."""
    def linear(k, fan_in, fan_out):
        kw, kb = jax.random.split(k)
        bound = 1.0 / jnp.sqrt(fan_in)
        w = jax.random.uniform(kw, (fan_in, fan_out), jnp.float32, -bound, bound)
        b = jax.random.uniform(kb, (1, fan_out), jnp.float32, -bound, bound)
        return w, b

    k1, k2, k3, k4 = jax.random.split(key, 4)
    w1, b1 = linear(k1, input_size, 16)
    w2, b2 = linear(k2, 16, encoding_dim)
    w3, b3 = linear(k3, encoding_dim, 16)
    w4, b4 = linear(k4, 16, input_size)
    return {"w1": w1, "b1": b1, "w2": w2, "b2": b2,
            "w3": w3, "b3": b3, "w4": w4, "b4": b4}


def _vmem_budget_bytes():
    """Per-generation VMEM budget (leave room for Mosaic internal scratch)."""
    try:
        cap = int(pltpu.get_tpu_info().vmem_capacity_bytes)
    except Exception:
        cap = 64 << 20          # conservative fallback (v7x-sized)
    return max(min(cap - (16 << 20), 100 << 20), 16 << 20)


def _choose_tile_b(batch, feat, param_bytes, budget):
    """Batch tile: ~4 MiB per x/out tile, constrained so double-buffered in/out tiles,
    in-kernel temporaries (~8 tile-equivalents total) and resident params fit the budget."""
    if batch <= SUBLANE:
        return batch                                   # full-dim block (always legal)
    row_bytes = feat * 4
    tb_target = max((4 << 20) // row_bytes, SUBLANE)
    avail = max(budget - 2 * param_bytes - (4 << 20), 8 * row_bytes * SUBLANE)
    tb_vmem = avail // (8 * row_bytes)
    tb = min(tb_target, tb_vmem, _round_up(batch, SUBLANE))
    tb = max((tb // SUBLANE) * SUBLANE, SUBLANE)
    return int(tb)


@jax.jit
def autoencoder_forward(x, params):
    """x: (B, input_size) float32. params: dict from init_params()."""
    B, F = x.shape

    args = (x,
            params["w1"], params["b1"],
            params["w2"], params["b2"],
            params["w3"], params["b3"],
            params["w4"], params["b4"])

    param_bytes = sum(int(a.size) * a.dtype.itemsize for a in args[1:])
    budget = _vmem_budget_bytes()
    tb = _choose_tile_b(B, F, param_bytes, budget)
    grid = (pl.cdiv(B, tb),)

    # x / out stream through VMEM in (tb, F) blocks; last dim == full array dim, so no
    # host-side feature padding is needed. Partial last batch block is clipped by Pallas.
    x_spec = pl.BlockSpec((tb, F), lambda i: (i, 0))
    out_spec = pl.BlockSpec((tb, F), lambda i: (i, 0))
    # Constant index_map -> weights/biases stay resident in VMEM across grid steps.
    const_specs = [pl.BlockSpec(a.shape, lambda i: (0, 0)) for a in args[1:]]

    out = pl.pallas_call(
        autoencoder_kernel,
        out_shape=jax.ShapeDtypeStruct((B, F), jnp.float32),
        grid=grid,
        in_specs=[x_spec] + const_specs,
        out_specs=out_spec,
        compiler_params=pltpu.CompilerParams(
            dimension_semantics=("parallel",),
            vmem_limit_bytes=int(budget),
        ),
    )(*args)
    return out


def reference_forward(x, p):
    """Pure-JAX f32 reference of the PyTorch forward (for correctness check)."""
    h = jnp.maximum(x @ p["w1"] + p["b1"], 0.0)
    h = jnp.maximum(h @ p["w2"] + p["b2"], 0.0)
    code = jax.nn.sigmoid(h)
    h = jnp.maximum(code @ p["w3"] + p["b3"], 0.0)
    return jax.nn.sigmoid(h @ p["w4"] + p["b4"])


if __name__ == "__main__":
    key = jax.random.PRNGKey(0)
    batch = 2
    input_size = 32
    encoding_dim = 8

    k_params, k_x = jax.random.split(key)
    params = init_params(k_params, input_size, encoding_dim)
    x = jax.random.normal(k_x, (batch, input_size), jnp.float32)

    out = jax.block_until_ready(autoencoder_forward(x, params))

    ref = reference_forward(x, params)
    assert out.shape == (batch, input_size)
    assert bool(jnp.all(jnp.isfinite(out)))
    # MXU default-precision dots + approx reciprocal => compare loosely against f32 reference.
    assert jnp.allclose(out, ref, atol=2e-2, rtol=2e-2), (
        f"max abs err {float(jnp.max(jnp.abs(out - ref)))}")

    print("KERNEL_OK")
</pallas_src>

<mosaic_0001>
module attributes {stable_mosaic.version = 11 : i64} {
  func.func @autoencoder_kernel(%arg0: i32, %arg1: memref<2x32xf32, #tpu.memory_space<vmem>>, %arg2: memref<32x16xf32, #tpu.memory_space<vmem>>, %arg3: memref<1x16xf32, #tpu.memory_space<vmem>>, %arg4: memref<16x8xf32, #tpu.memory_space<vmem>>, %arg5: memref<1x8xf32, #tpu.memory_space<vmem>>, %arg6: memref<8x16xf32, #tpu.memory_space<vmem>>, %arg7: memref<1x16xf32, #tpu.memory_space<vmem>>, %arg8: memref<16x32xf32, #tpu.memory_space<vmem>>, %arg9: memref<1x32xf32, #tpu.memory_space<vmem>>, %arg10: memref<2x32xf32, #tpu.memory_space<vmem>>) attributes {dimension_semantics = [#tpu.dimension_semantics<parallel>], iteration_bounds = array<i64: 1>, scalar_prefetch = 0 : i64, scratch_operands = 0 : i64, tpu.core_type = #tpu.core_type<tc>, window_params = [{transform_indices = @transform_0, window_bounds = array<i64: 2, 32>}, {pipeline_mode = #tpu.pipeline_mode<synchronous>, transform_indices = @transform_1, window_bounds = array<i64: 32, 16>}, {pipeline_mode = #tpu.pipeline_mode<synchronous>, transform_indices = @transform_2, window_bounds = array<i64: 1, 16>}, {pipeline_mode = #tpu.pipeline_mode<synchronous>, transform_indices = @transform_3, window_bounds = array<i64: 16, 8>}, {pipeline_mode = #tpu.pipeline_mode<synchronous>, transform_indices = @transform_4, window_bounds = array<i64: 1, 8>}, {pipeline_mode = #tpu.pipeline_mode<synchronous>, transform_indices = @transform_5, window_bounds = array<i64: 8, 16>}, {pipeline_mode = #tpu.pipeline_mode<synchronous>, transform_indices = @transform_6, window_bounds = array<i64: 1, 16>}, {pipeline_mode = #tpu.pipeline_mode<synchronous>, transform_indices = @transform_7, window_bounds = array<i64: 16, 32>}, {pipeline_mode = #tpu.pipeline_mode<synchronous>, transform_indices = @transform_8, window_bounds = array<i64: 1, 32>}, {transform_indices = @transform_9, window_bounds = array<i64: 2, 32>}]} {
    %c0 = arith.constant 0 : index
    %c0_0 = arith.constant 0 : index
    %0 = vector.load %arg1[%c0, %c0_0] : memref<2x32xf32, #tpu.memory_space<vmem>>, vector<2x32xf32>
    %c0_1 = arith.constant 0 : index
    %c0_2 = arith.constant 0 : index
    %1 = vector.load %arg2[%c0_1, %c0_2] : memref<32x16xf32, #tpu.memory_space<vmem>>, vector<32x16xf32>
    %cst = arith.constant dense<0.000000e+00> : vector<2x16xf32>
    %2 = tpu.matmul %0, %1, %cst {dimension_numbers = #tpu.dot_dimension_numbers<[1], [0], [0], [1], [0, 0, 1, 1], [], []>} : vector<2x32xf32>, vector<32x16xf32>, vector<2x16xf32> -> vector<2x16xf32>
    %c0_3 = arith.constant 0 : index
    %c0_4 = arith.constant 0 : index
    %3 = vector.load %arg3[%c0_3, %c0_4] : memref<1x16xf32, #tpu.memory_space<vmem>>, vector<1x16xf32>
    %4 = vector.broadcast %3 : vector<1x16xf32> to vector<2x16xf32>
    %5 = arith.addf %2, %4 : vector<2x16xf32>
    %cst_5 = arith.constant 0.000000e+00 : f32
    %6 = vector.broadcast %cst_5 : f32 to vector<2x16xf32>
    %7 = arith.maximumf %5, %6 : vector<2x16xf32>
    %c0_6 = arith.constant 0 : index
    %c0_7 = arith.constant 0 : index
    %8 = vector.load %arg4[%c0_6, %c0_7] : memref<16x8xf32, #tpu.memory_space<vmem>>, vector<16x8xf32>
    %cst_8 = arith.constant dense<0.000000e+00> : vector<2x8xf32>
    %9 = tpu.matmul %7, %8, %cst_8 {dimension_numbers = #tpu.dot_dimension_numbers<[1], [0], [0], [1], [0, 0, 1, 1], [], []>} : vector<2x16xf32>, vector<16x8xf32>, vector<2x8xf32> -> vector<2x8xf32>
    %c0_9 = arith.constant 0 : index
    %c0_10 = arith.constant 0 : index
    %10 = vector.load %arg5[%c0_9, %c0_10] : memref<1x8xf32, #tpu.memory_space<vmem>>, vector<1x8xf32>
    %11 = vector.broadcast %10 : vector<1x8xf32> to vector<2x8xf32>
    %12 = arith.addf %9, %11 : vector<2x8xf32>
    %cst_11 = arith.constant 0.000000e+00 : f32
    %13 = vector.broadcast %cst_11 : f32 to vector<2x8xf32>
    %14 = arith.maximumf %12, %13 : vector<2x8xf32>
    %15 = math.absf %14 : vector<2x8xf32>
    %cst_12 = arith.constant 0.000000e+00 : f32
    %16 = vector.broadcast %cst_12 : f32 to vector<2x8xf32>
    %17 = arith.subf %16, %15 : vector<2x8xf32>
    %18 = math.exp %17 : vector<2x8xf32>
    %cst_13 = arith.constant 1.000000e+00 : f32
    %19 = vector.broadcast %cst_13 : f32 to vector<2x8xf32>
    %20 = arith.addf %19, %18 : vector<2x8xf32>
    %21 = tpu.reciprocal %20 {approx = true} : vector<2x8xf32> -> vector<2x8xf32>
    %cst_14 = arith.constant 0.000000e+00 : f32
    %22 = vector.broadcast %cst_14 : f32 to vector<2x8xf32>
    %23 = arith.cmpf oge, %14, %22 : vector<2x8xf32>
    %cst_15 = arith.constant 1.000000e+00 : f32
    %24 = vector.broadcast %cst_15 : f32 to vector<2x8xf32>
    %25 = arith.subf %24, %21 : vector<2x8xf32>
    %26 = arith.select %23, %21, %25 : vector<2x8xi1>, vector<2x8xf32>
    %c0_16 = arith.constant 0 : index
    %c0_17 = arith.constant 0 : index
    %27 = vector.load %arg6[%c0_16, %c0_17] : memref<8x16xf32, #tpu.memory_space<vmem>>, vector<8x16xf32>
    %cst_18 = arith.constant dense<0.000000e+00> : vector<2x16xf32>
    %28 = tpu.matmul %26, %27, %cst_18 {dimension_numbers = #tpu.dot_dimension_numbers<[1], [0], [0], [1], [0, 0, 1, 1], [], []>} : vector<2x8xf32>, vector<8x16xf32>, vector<2x16xf32> -> vector<2x16xf32>
    %c0_19 = arith.constant 0 : index
    %c0_20 = arith.constant 0 : index
    %29 = vector.load %arg7[%c0_19, %c0_20] : memref<1x16xf32, #tpu.memory_space<vmem>>, vector<1x16xf32>
    %30 = vector.broadcast %29 : vector<1x16xf32> to vector<2x16xf32>
    %31 = arith.addf %28, %30 : vector<2x16xf32>
    %cst_21 = arith.constant 0.000000e+00 : f32
    %32 = vector.broadcast %cst_21 : f32 to vector<2x16xf32>
    %33 = arith.maximumf %31, %32 : vector<2x16xf32>
    %c0_22 = arith.constant 0 : index
    %c0_23 = arith.constant 0 : index
    %34 = vector.load %arg8[%c0_22, %c0_23] : memref<16x32xf32, #tpu.memory_space<vmem>>, vector<16x32xf32>
    %cst_24 = arith.constant dense<0.000000e+00> : vector<2x32xf32>
    %35 = tpu.matmul %33, %34, %cst_24 {dimension_numbers = #tpu.dot_dimension_numbers<[1], [0], [0], [1], [0, 0, 1, 1], [], []>} : vector<2x16xf32>, vector<16x32xf32>, vector<2x32xf32> -> vector<2x32xf32>
    %c0_25 = arith.constant 0 : index
    %c0_26 = arith.constant 0 : index
    %36 = vector.load %arg9[%c0_25, %c0_26] : memref<1x32xf32, #tpu.memory_space<vmem>>, vector<1x32xf32>
    %37 = vector.broadcast %36 : vector<1x32xf32> to vector<2x32xf32>
    %38 = arith.addf %35, %37 : vector<2x32xf32>
    %39 = math.absf %38 : vector<2x32xf32>
    %cst_27 = arith.constant 0.000000e+00 : f32
    %40 = vector.broadcast %cst_27 : f32 to vector<2x32xf32>
    %41 = arith.subf %40, %39 : vector<2x32xf32>
    %42 = math.exp %41 : vector<2x32xf32>
    %cst_28 = arith.constant 1.000000e+00 : f32
    %43 = vector.broadcast %cst_28 : f32 to vector<2x32xf32>
    %44 = arith.addf %43, %42 : vector<2x32xf32>
    %45 = tpu.reciprocal %44 {approx = true} : vector<2x32xf32> -> vector<2x32xf32>
    %cst_29 = arith.constant 0.000000e+00 : f32
    %46 = vector.broadcast %cst_29 : f32 to vector<2x32xf32>
    %47 = arith.cmpf oge, %38, %46 : vector<2x32xf32>
    %cst_30 = arith.constant 1.000000e+00 : f32
    %48 = vector.broadcast %cst_30 : f32 to vector<2x32xf32>
    %49 = arith.subf %48, %45 : vector<2x32xf32>
    %50 = arith.select %47, %45, %49 : vector<2x32xi1>, vector<2x32xf32>
    %c0_31 = arith.constant 0 : index
    %c0_32 = arith.constant 0 : index
    %51 = vector.load %arg10[%c0_31, %c0_32] : memref<2x32xf32, #tpu.memory_space<vmem>>, vector<2x32xf32>
    tpu.vector_store %arg10[%c0_31, %c0_32], %50 {strides = array<i32>} : memref<2x32xf32, #tpu.memory_space<vmem>>, vector<2x32xf32>,
    return
  }
  func.func @transform_0(%arg0: i32) -> (i32, i32) {
    %c0_i32 = arith.constant 0 : i32
    %c0_i32_0 = arith.constant 0 : i32
    return %arg0, %c0_i32 : i32, i32
  }
  func.func @transform_1(%arg0: i32) -> (i32, i32) {
    %c0_i32 = arith.constant 0 : i32
    %c0_i32_0 = arith.constant 0 : i32
    %c0_i32_1 = arith.constant 0 : i32
    return %c0_i32, %c0_i32_0 : i32, i32
  }
  func.func @transform_2(%arg0: i32) -> (i32, i32) {
    %c0_i32 = arith.constant 0 : i32
    %c0_i32_0 = arith.constant 0 : i32
    %c0_i32_1 = arith.constant 0 : i32
    return %c0_i32, %c0_i32_0 : i32, i32
  }
  func.func @transform_3(%arg0: i32) -> (i32, i32) {
    %c0_i32 = arith.constant 0 : i32
    %c0_i32_0 = arith.constant 0 : i32
    %c0_i32_1 = arith.constant 0 : i32
    return %c0_i32, %c0_i32_0 : i32, i32
  }
  func.func @transform_4(%arg0: i32) -> (i32, i32) {
    %c0_i32 = arith.constant 0 : i32
    %c0_i32_0 = arith.constant 0 : i32
    %c0_i32_1 = arith.constant 0 : i32
    return %c0_i32, %c0_i32_0 : i32, i32
  }
  func.func @transform_5(%arg0: i32) -> (i32, i32) {
    %c0_i32 = arith.constant 0 : i32
    %c0_i32_0 = arith.constant 0 : i32
    %c0_i32_1 = arith.constant 0 : i32
    return %c0_i32, %c0_i32_0 : i32, i32
  }
  func.func @transform_6(%arg0: i32) -> (i32, i32) {
    %c0_i32 = arith.constant 0 : i32
    %c0_i32_0 = arith.constant 0 : i32
    %c0_i32_1 = arith.constant 0 : i32
    return %c0_i32, %c0_i32_0 : i32, i32
  }
  func.func @transform_7(%arg0: i32) -> (i32, i32) {
    %c0_i32 = arith.constant 0 : i32
    %c0_i32_0 = arith.constant 0 : i32
    %c0_i32_1 = arith.constant 0 : i32
    return %c0_i32, %c0_i32_0 : i32, i32
  }
  func.func @transform_8(%arg0: i32) -> (i32, i32) {
    %c0_i32 = arith.constant 0 : i32
    %c0_i32_0 = arith.constant 0 : i32
    %c0_i32_1 = arith.constant 0 : i32
    return %c0_i32, %c0_i32_0 : i32, i32
  }
  func.func @transform_9(%arg0: i32) -> (i32, i32) {
    %c0_i32 = arith.constant 0 : i32
    %c0_i32_0 = arith.constant 0 : i32
    return %arg0, %c0_i32 : i32, i32
  }
}

</mosaic_0001>

<bundles_post_ra>
// kernel: autoencoder_forward.1
= control target key start
LH: loop header
LB: loop body
LE: loop exit
PB: predicated region body
PF: predicated region fallthrough
CT: control target
= control target key end

     0   :  { %s334_s0 = inlined_call_operand.vmem [shape: f32[2,32], index: 0, kind: input, shape index: {}]   ;;  %s335_s1 = inlined_call_operand.vmem [shape: f32[32,16], index: 1, kind: input, shape index: {}]   ;;  %s336_s2 = inlined_call_operand.vmem [shape: f32[1,16], index: 2, kind: input, shape index: {}]   ;;  %s337_s3 = inlined_call_operand.vmem [shape: f32[16,8], index: 3, kind: input, shape index: {}]   ;;  %s338_s4 = inlined_call_operand.vmem [shape: f32[1,8], index: 4, kind: input, shape index: {}]   ;;  %s339_s5 = inlined_call_operand.vmem [shape: f32[8,16], index: 5, kind: input, shape index: {}]   ;;  %s340_s6 = inlined_call_operand.vmem [shape: f32[1,16], index: 6, kind: input, shape index: {}]   ;;  %s341_s7 = inlined_call_operand.vmem [shape: f32[16,32], index: 7, kind: input, shape index: {}]   ;;  %s342_s8 = inlined_call_operand.vmem [shape: f32[1,32], index: 8, kind: input, shape index: {}]   ;;  %s343_s9 = inlined_call_operand.hbm [shape: f32[2,32], index: 9, kind: output, shape index: {}]  }
   0x1   :  { %v37_v0 = vld [vmem:[%s335_s1 + $0x18] sm:$0xff]  ;;  %v36_v1 = vld [vmem:[%s335_s1 + $0x10] sm:$0xff]  ;;  %v35_v2 = vld [vmem:[%s335_s1 + $0x8] sm:$0xff] }
   0x2   :  { %58 = vmatpush.msra.mxu0 %v37_v0 }
   0x4   :  { %59 = vmatpush.msra.mxu0 %v36_v1 }
   0x5   :  { %14 = vsyncpa [#allocation3], 0  ;;  %v34_v3 = vld [vmem:[%s335_s1] sm:$0xff]  ;;  %vm42_vm0 = vcmask 261120   ;;  %v68_v5 = vld [vmem:[%s337_s3 + $0x8] sm:$0xff]  ;;  %vm73_vm1 = vcmask 130048  }
   0x6   :  { %60 = vmatpush.msra.mxu0 %v35_v2  ;;  %v33_v4 = vld [vmem:[%s334_s0] sm:$0x3]  ;;  %91 = vmatpush.msra.mxu1 %v68_v5  ;;  %vm112_vm2 = vcmask 64512   ;;  %v138_v24 = vld [vmem:[%s341_s7 + $0x8] sm:$0xff]  ;;  %s184_s12 = sshll.u32 %s343_s9, 4  ;;  %vm175_vm4 = vcmask 254976   ;;  %s185_s12 = int_to_ptr.hbm [resolvable:$true] %s184_s12 }
   0x7   :  { %v67_v6 = vld [vmem:[%s337_s3] sm:$0xff]  ;;  %160 = vmatpush.msra.mxu3 %v138_v24 }
   0x8   :  { %61 = vmatpush.msra.mxu0 %v34_v3  ;;  %92 = vmatpush.msra.mxu1 %v67_v6  ;;  %v198_v7 = vld [vmem:[%s336_s2] ss:$0 sm:$0xff] }
   0x9   :  { %193 = vmatmul.msk.f32.vlgmr.msra.gmra.mxu0 %vm42_vm0, %v33_v4  ;;  %v107_v11 = vld [vmem:[%s339_s5] sm:$0xff] }
   0xa   :  { %131 = vmatpush.msra.mxu2 %v107_v11  ;;  %v199_v12 = vld [vmem:[%s338_s4] ss:$0 sm:$0xff] }
   0xb   :  { %v137_v25 = vld [vmem:[%s341_s7] sm:$0xff]  ;;  %s236_s7 = smov [#allocation2]  }
   0xc   :  { %161 = vmatpush.msra.mxu3 %v137_v25  ;;  %v200_v26 = vld [vmem:[%s340_s6] ss:$0 sm:$0xff]  ;;  %s182_s6 = sshll.u32 %s236_s7, 4  ;;  %s183_s6 = int_to_ptr.vmem [resolvable:$true] %s182_s6 }
   0xd   :  { %v201_v30 = vld [vmem:[%s342_s8] ss:$0 sm:$0xff] }
  0x86   :  { %v63_v8 = vpop.f32.mrf.mxu0 }
  0x87   :  { %v64_v9 = vadd.f32 %v198_v7, %v63_v8 }
  0x89   :  { %v66_v10 = vmax.f32 %v64_v9, 0.0 }
  0x8b   :  { %194 = vmatmul.msk.f32.vlgmr.msra.gmra.mxu1 %vm73_vm1, %v66_v10 }
 0x108   :  { %v94_v13 = vpop.f32.mrf.mxu1 }
 0x109   :  { %v95_v14 = vadd.f32 %v199_v12, %v94_v13 }
 0x10b   :  { %v97_v15 = vmax.f32 %v95_v14, 0.0 }
 0x10d   :  { %v98_v16 = vand.u32 2147483647, %v97_v15  ;;  %vm104_vm3 = vcmp.ge.f32.partialorder %v97_v15, 0.0 }
 0x10f   :  { %v99_v17 = vsub.f32 0.0, %v98_v16 }
 0x111   :  { %v100_v18 = vmul.f32 1.442695, %v99_v17 }
 0x113   :  { %202 = vpow2.f32 %v100_v18 }
 0x119   :  { %v203_v19 = vpop.eup %202 }
 0x11a   :  { %v102_v20 = vadd.f32 1.0, %v203_v19 }
 0x11c   :  { %204 = vrcp.f32 %v102_v20 }
 0x122   :  { %v205_v21 = vpop.eup %204 }
 0x123   :  { %v105_v22 = vsub.f32 1.0, %v205_v21 }
 0x125   :  { %v106_v23 = vsel %vm104_vm3, %v205_v21, %v105_v22 }
 0x126   :  { %195 = vmatmul.msk.f32.vlgmr.msra.gmra.mxu2 %vm112_vm2, %v106_v23 }
 0x1a9   :  { %v133_v27 = vpop.f32.mrf.mxu2 }
 0x1aa   :  { %v134_v28 = vadd.f32 %v200_v26, %v133_v27 }
 0x1ac   :  { %v136_v29 = vmax.f32 %v134_v28, 0.0 }
 0x1ae   :  { %196 = vmatmul.msk.f32.vlgmr.msra.gmra.mxu3 %vm73_vm1, %v136_v29 }
 0x231   :  { %v163_v31 = vpop.f32.mrf.mxu3 }
 0x232   :  { %v164_v32 = vadd.f32 %v201_v30, %v163_v31 }
 0x234   :  { %v166_v33 = vand.u32 2147483647, %v164_v32  ;;  %vm172_vm5 = vcmp.ge.f32.partialorder %v164_v32, 0.0 }
 0x236   :  { %v167_v34 = vsub.f32 0.0, %v166_v33 }
 0x238   :  { %v168_v35 = vmul.f32 1.442695, %v167_v34 }
 0x23a   :  { %206 = vpow2.f32 %v168_v35 }
 0x240   :  { %v207_v36 = vpop.eup %206 }
 0x241   :  { %v170_v37 = vadd.f32 1.0, %v207_v36 }
 0x243   :  { %208 = vrcp.f32 %v170_v37 }
 0x249   :  { %v209_v38 = vpop.eup %208 }
 0x24a   :  { %v173_v39 = vsub.f32 1.0, %v209_v38 }
 0x24c   :  { %v174_v40 = vsel %vm172_vm5, %v209_v38, %v173_v39 }
 0x24d   :  { %176 = vst.msk [vmem:[#allocation2] sm:$0x3] %vm175_vm4, %v174_v40 }
 0x24e   :  { %187 = dma.vmem_to_hbm [thread:$0]  %s183_s6, 32, %s185_s12, [#allocation3]  }
 0x24f   :  { %234 = dma.done.wait [#allocation3], 32  }
 0x250   :  { %235 = vsyncadd [#allocation3], 4294967264 }
 0x251   :  { %192 = vsyncpa [#allocation3], 1 }

</bundles_post_ra>
